<compile_context>
chip_gen: v7x
topology: tpu7x:2x2x1
jax: 0.10.0
libtpu: 0.0.40
codegen_flags: <defaults>
</compile_context>

<pallas_src>
import math

import numpy as np
import jax
import jax.numpy as jnp
from jax import lax
from jax.experimental import pallas as pl
from jax.experimental.pallas import tpu as pltpu

EMBED_DIM = 512        # P-embedding dim (hard-coded default inside the torch module)
RES_DIM   = 128        # res_dim
SIGMA_C   = 1.0
RANGE_C   = (-4.0, 4.0)
NEG_SLOPE = 0.01       # nn.LeakyReLU default negative_slope
_POS_STEP = (RANGE_C[1] - RANGE_C[0]) / (EMBED_DIM - 1)


# ----------------------------------------------------------------------------
# Kernel: Gaussian P-embedding (x3, lane-concatenated) + single folded K=1536
#         bf16 dot + LeakyReLU + f32 fc4_out
# ----------------------------------------------------------------------------
def _cembedder_kernel(c_ref, wcat_ref, bz_ref, w4_ref, b4_ref, o_ref):
    # pos generated in-kernel: identical to torch.range(start, end, step).
    pos = (lax.broadcasted_iota(jnp.int32, (1, EMBED_DIM), 1).astype(jnp.float32)
           * _POS_STEP + RANGE_C[0])                       # [1, D]
    inv2s2 = 0.5 / (SIGMA_C * SIGMA_C)

    def branch_e(idx):
        c = c_ref[:, idx:idx + 1]                          # [Bt, 1]
        d = pos - c                                        # [Bt, D]
        e = jnp.exp(-inv2s2 * d * d)                       # Gaussian P-embedding
        s = jnp.sum(e, axis=-1, keepdims=True)             # [Bt, 1]
        return e * (1.0 / s)                               # exact f32 normalization

    # Each piece is 512 lanes (128-aligned) -> concat is pure vreg assembly.
    e_cat = jnp.concatenate([branch_e(0), branch_e(1), branch_e(2)], axis=-1)

    # bf16 operands, f32 accumulation: single-pass MXU, one K=1536 chain.
    z = jnp.dot(e_cat.astype(jnp.bfloat16), wcat_ref[...],
                preferred_element_type=jnp.float32) + bz_ref[...]   # [Bt, 256]
    z = jnp.where(z >= 0, z, NEG_SLOPE * z)                # LeakyReLU

    # fc4_out kept in f32 (tolerance-critical; tiny weight: 128 KiB).
    out = jnp.dot(z, w4_ref[...], preferred_element_type=jnp.float32) + b4_ref[...]
    o_ref[...] = out.astype(o_ref.dtype)


# ----------------------------------------------------------------------------
# Parameters
# ----------------------------------------------------------------------------
def init_params(key):
    """Deterministic nn.Linear-style init. Weights stored as [in, out] (= torch W.T)."""
    keys = jax.random.split(key, 11)

    def linear(k, fan_in, fan_out):
        kw, kb = jax.random.split(k)
        bound = 1.0 / math.sqrt(fan_in)
        w = jax.random.uniform(kw, (fan_in, fan_out), jnp.float32, -bound, bound)
        b = jax.random.uniform(kb, (1, fan_out), jnp.float32, -bound, bound)
        return w, b

    p, ki = [], 0
    for _ in range(3):                                    # c11, c12, c44 branches
        p += list(linear(keys[ki], EMBED_DIM, RES_DIM));      ki += 1
        p += list(linear(keys[ki], RES_DIM, 2 * RES_DIM));    ki += 1
        p += list(linear(keys[ki], 2 * RES_DIM, RES_DIM));    ki += 1
    p += list(linear(keys[ki], 3 * RES_DIM, 2 * RES_DIM));    ki += 1   # fc3_out
    p += list(linear(keys[ki], 2 * RES_DIM, RES_DIM));        ki += 1   # fc4_out
    return p


def fold_params(params):
    """Fold fc1->fc2->fc3 (no activation between) through the matching fc3_out
    slice, per branch, on the host in float64 (exact), then concatenate the
    three folded weights along K and cast the big weight to bf16 once."""
    p64 = [np.asarray(a, dtype=np.float64) for a in params]
    (w1a, b1a, w2a, b2a, w3a, b3a,
     w1b, b1b, w2b, b2b, w3b, b3b,
     w1c, b1c, w2c, b2c, w3c, b3c,
     w3o, b3o, w4o64, b4o64) = p64
    R = RES_DIM
    w3o_slices = (w3o[:R], w3o[R:2 * R], w3o[2 * R:])     # cat([h11,h12,h44]) order

    def fold(w1, b1, w2, b2, w3, b3, w3o_s):
        W = ((w1 @ w2) @ w3) @ w3o_s                      # [512, 256]
        b = ((b1 @ w2) @ w3 + b2 @ w3 + b3) @ w3o_s       # [1, 256]
        return W, b

    Wa, ba = fold(w1a, b1a, w2a, b2a, w3a, b3a, w3o_slices[0])
    Wb, bb = fold(w1b, b1b, w2b, b2b, w3b, b3b, w3o_slices[1])
    Wc, bc = fold(w1c, b1c, w2c, b2c, w3c, b3c, w3o_slices[2])

    wcat = np.concatenate([Wa, Wb, Wc], axis=0)           # [1536, 256]
    bz = ba + bb + bc + b3o                               # [1, 256]

    wcat_bf16 = jnp.asarray(wcat.astype(np.float32)).astype(jnp.bfloat16)
    bz_f32 = jnp.asarray(bz.astype(np.float32))
    w4o = params[-2]                                      # keep original f32
    b4o = params[-1]
    return (wcat_bf16, bz_f32, w4o, b4o)


# ----------------------------------------------------------------------------
# Wrapper
# ----------------------------------------------------------------------------
def _sim_c(x):
    b = x.shape[0]
    Cm = x.reshape(b, 6, 6)
    C11 = (Cm[:, 0, 0] + Cm[:, 1, 1] + Cm[:, 2, 2])[:, None] / 3.0
    C12 = (Cm[:, 0, 1] + Cm[:, 1, 2] + Cm[:, 0, 2]
           + Cm[:, 1, 0] + Cm[:, 2, 1] + Cm[:, 2, 0])[:, None] / 6.0
    C44 = (Cm[:, 3, 3] + Cm[:, 4, 4] + Cm[:, 5, 5])[:, None] / 3.0
    return jnp.concatenate([C11, C12, C44], axis=-1).astype(jnp.float32)   # [B, 3]


def _round_up(x, m):
    return (x + m - 1) // m * m


def _choose_tiling(b):
    """Small batch: one padded block.  Large batch: tiles up to 512 rows, but
    keep nblk >= 2 so both v7x TensorCores get work on the parallel axis."""
    if b <= 256:
        bt = _round_up(b, 8)
        return bt, bt
    bt = min(512, _round_up(_round_up(b, 8) // 2, 8))
    return bt, _round_up(b, bt)


@jax.jit
def cembedder_vf_forward(x, folded_params):
    wcat, bz, w4o, b4o = folded_params
    b = x.shape[0]
    c_sim = _sim_c(x)                                                      # [B, 3]

    bt, b_pad = _choose_tiling(b)
    if b_pad != b:
        c_sim = jnp.pad(c_sim, ((0, b_pad - b), (0, 0)))
    nblk = b_pad // bt

    weight_spec = lambda shape: pl.BlockSpec(shape, lambda i: (0, 0))

    emb = pl.pallas_call(
        _cembedder_kernel,
        out_shape=jax.ShapeDtypeStruct((b_pad, RES_DIM), jnp.float32),
        grid=(nblk,),
        in_specs=[
            pl.BlockSpec((bt, 3), lambda i: (i, 0)),                 # c_sim tile
            weight_spec((3 * EMBED_DIM, 2 * RES_DIM)),               # folded Wcat (bf16)
            weight_spec((1, 2 * RES_DIM)),                           # bz (folded, f32)
            weight_spec((2 * RES_DIM, RES_DIM)),                     # fc4_out W (f32)
            weight_spec((1, RES_DIM)),                               # fc4_out b (f32)
        ],
        out_specs=pl.BlockSpec((bt, RES_DIM), lambda i: (i, 0)),     # lane-dense 128
        compiler_params=pltpu.CompilerParams(
            dimension_semantics=("parallel",),
            vmem_limit_bytes=32 * 1024 * 1024),
    )(c_sim, wcat, bz, w4o, b4o)
    return emb[:b, None, :]                  # torch.unsqueeze(emb, dim=1): [B,1,R]


# ----------------------------------------------------------------------------
# Pure-JAX reference mirroring the (unfused) PyTorch module, vf=False path.
# All matmuls at precision='highest' so this is a true f32 gold reference.
# ----------------------------------------------------------------------------
def reference_forward(x, params):
    HI = jax.lax.Precision.HIGHEST
    c_sim = _sim_c(x)                                                      # [B, 3]
    pos = RANGE_C[0] + jnp.arange(EMBED_DIM, dtype=jnp.float32) * _POS_STEP
    d = pos[None, None, :] - c_sim[:, :, None]                             # [B, 3, D]
    e = jnp.exp(-0.5 * d * d / (SIGMA_C ** 2))
    e = e / jnp.sum(e, axis=-1, keepdims=True)

    (w1a, b1a, w2a, b2a, w3a, b3a,
     w1b, b1b, w2b, b2b, w3b, b3b,
     w1c, b1c, w2c, b2c, w3c, b3c,
     w3o, b3o, w4o, b4o) = params

    def mlp(v, w1, b1, w2, b2, w3, b3):
        h = jnp.dot(v, w1, precision=HI) + b1
        h = jnp.dot(h, w2, precision=HI) + b2
        h = jnp.dot(h, w3, precision=HI) + b3
        return h

    h11 = mlp(e[:, 0, :], w1a, b1a, w2a, b2a, w3a, b3a)
    h12 = mlp(e[:, 1, :], w1b, b1b, w2b, b2b, w3b, b3b)
    h44 = mlp(e[:, 2, :], w1c, b1c, w2c, b2c, w3c, b3c)
    cat = jnp.concatenate([h11, h12, h44], axis=-1)
    z = jnp.dot(cat, w3o, precision=HI) + b3o
    z = jnp.where(z >= 0, z, NEG_SLOPE * z)
    out = jnp.dot(z, w4o, precision=HI) + b4o
    return out[:, None, :]


if __name__ == "__main__":
    key = jax.random.PRNGKey(0)
    kx, kp = jax.random.split(key)

    B = 2
    x = jax.random.normal(kx, (B, 36), dtype=jnp.float32)   # flattened 6x6 C matrices
    params = init_params(kp)
    folded = fold_params(params)                             # fold once, outside forward

    out = cembedder_vf_forward(x, folded)
    out = jax.block_until_ready(out)

    ref = reference_forward(x, params)
    assert out.shape == (B, 1, RES_DIM), out.shape
    assert jnp.allclose(out, ref, atol=2e-4, rtol=2e-4), \
        float(jnp.max(jnp.abs(out - ref)))

    print("KERNEL_OK")
</pallas_src>

<mosaic_0001>
module attributes {stable_mosaic.version = 11 : i64} {
  func.func @_cembedder_kernel(%arg0: i32, %arg1: memref<8x3xf32, #tpu.memory_space<vmem>>, %arg2: memref<1536x256xbf16, #tpu.memory_space<vmem>>, %arg3: memref<1x256xf32, #tpu.memory_space<vmem>>, %arg4: memref<256x128xf32, #tpu.memory_space<vmem>>, %arg5: memref<1x128xf32, #tpu.memory_space<vmem>>, %arg6: memref<8x128xf32, #tpu.memory_space<vmem>>) attributes {dimension_semantics = [#tpu.dimension_semantics<parallel>], iteration_bounds = array<i64: 1>, scalar_prefetch = 0 : i64, scratch_operands = 0 : i64, tpu.core_type = #tpu.core_type<tc>, window_params = [{transform_indices = @transform_0, window_bounds = array<i64: 8, 3>}, {pipeline_mode = #tpu.pipeline_mode<synchronous>, transform_indices = @transform_1, window_bounds = array<i64: 1536, 256>}, {pipeline_mode = #tpu.pipeline_mode<synchronous>, transform_indices = @transform_2, window_bounds = array<i64: 1, 256>}, {pipeline_mode = #tpu.pipeline_mode<synchronous>, transform_indices = @transform_3, window_bounds = array<i64: 256, 128>}, {pipeline_mode = #tpu.pipeline_mode<synchronous>, transform_indices = @transform_4, window_bounds = array<i64: 1, 128>}, {transform_indices = @transform_5, window_bounds = array<i64: 8, 128>}]} {
    %0 = tpu.iota {dimensions = array<i32: 1>} : vector<1x512xi32>
    %1 = arith.sitofp %0 : vector<1x512xi32> to vector<1x512xf32>
    %cst = arith.constant 0.0156555772 : f32
    %2 = vector.broadcast %cst : f32 to vector<1x512xf32>
    %3 = arith.mulf %1, %2 : vector<1x512xf32>
    %cst_0 = arith.constant -4.000000e+00 : f32
    %4 = vector.broadcast %cst_0 : f32 to vector<1x512xf32>
    %5 = arith.addf %3, %4 : vector<1x512xf32>
    %c0 = arith.constant 0 : index
    %c0_1 = arith.constant 0 : index
    %6 = vector.load %arg1[%c0, %c0_1] : memref<8x3xf32, #tpu.memory_space<vmem>>, vector<8x1xf32>
    %7 = vector.broadcast %5 : vector<1x512xf32> to vector<8x512xf32>
    %8 = vector.broadcast %6 : vector<8x1xf32> to vector<8x512xf32>
    %9 = arith.subf %7, %8 : vector<8x512xf32>
    %cst_2 = arith.constant -5.000000e-01 : f32
    %10 = vector.broadcast %cst_2 : f32 to vector<8x512xf32>
    %11 = arith.mulf %10, %9 : vector<8x512xf32>
    %12 = arith.mulf %11, %9 : vector<8x512xf32>
    %13 = math.exp %12 : vector<8x512xf32>
    %cst_3 = arith.constant dense<0.000000e+00> : vector<8xf32>
    %14 = vector.multi_reduction <add>, %13, %cst_3 [1] : vector<8x512xf32> to vector<8xf32>
    %15 = vector.shape_cast %14 : vector<8xf32> to vector<8x1xf32>
    %cst_4 = arith.constant 1.000000e+00 : f32
    %16 = vector.broadcast %cst_4 : f32 to vector<8x1xf32>
    %17 = arith.divf %16, %15 : vector<8x1xf32>
    %18 = vector.broadcast %17 : vector<8x1xf32> to vector<8x512xf32>
    %19 = arith.mulf %13, %18 : vector<8x512xf32>
    %c0_5 = arith.constant 0 : index
    %c1 = arith.constant 1 : index
    %20 = vector.load %arg1[%c0_5, %c1] : memref<8x3xf32, #tpu.memory_space<vmem>>, vector<8x1xf32>
    %21 = vector.broadcast %5 : vector<1x512xf32> to vector<8x512xf32>
    %22 = vector.broadcast %20 : vector<8x1xf32> to vector<8x512xf32>
    %23 = arith.subf %21, %22 : vector<8x512xf32>
    %cst_6 = arith.constant -5.000000e-01 : f32
    %24 = vector.broadcast %cst_6 : f32 to vector<8x512xf32>
    %25 = arith.mulf %24, %23 : vector<8x512xf32>
    %26 = arith.mulf %25, %23 : vector<8x512xf32>
    %27 = math.exp %26 : vector<8x512xf32>
    %cst_7 = arith.constant dense<0.000000e+00> : vector<8xf32>
    %28 = vector.multi_reduction <add>, %27, %cst_7 [1] : vector<8x512xf32> to vector<8xf32>
    %29 = vector.shape_cast %28 : vector<8xf32> to vector<8x1xf32>
    %cst_8 = arith.constant 1.000000e+00 : f32
    %30 = vector.broadcast %cst_8 : f32 to vector<8x1xf32>
    %31 = arith.divf %30, %29 : vector<8x1xf32>
    %32 = vector.broadcast %31 : vector<8x1xf32> to vector<8x512xf32>
    %33 = arith.mulf %27, %32 : vector<8x512xf32>
    %c0_9 = arith.constant 0 : index
    %c2 = arith.constant 2 : index
    %34 = vector.load %arg1[%c0_9, %c2] : memref<8x3xf32, #tpu.memory_space<vmem>>, vector<8x1xf32>
    %35 = vector.broadcast %5 : vector<1x512xf32> to vector<8x512xf32>
    %36 = vector.broadcast %34 : vector<8x1xf32> to vector<8x512xf32>
    %37 = arith.subf %35, %36 : vector<8x512xf32>
    %cst_10 = arith.constant -5.000000e-01 : f32
    %38 = vector.broadcast %cst_10 : f32 to vector<8x512xf32>
    %39 = arith.mulf %38, %37 : vector<8x512xf32>
    %40 = arith.mulf %39, %37 : vector<8x512xf32>
    %41 = math.exp %40 : vector<8x512xf32>
    %cst_11 = arith.constant dense<0.000000e+00> : vector<8xf32>
    %42 = vector.multi_reduction <add>, %41, %cst_11 [1] : vector<8x512xf32> to vector<8xf32>
    %43 = vector.shape_cast %42 : vector<8xf32> to vector<8x1xf32>
    %cst_12 = arith.constant 1.000000e+00 : f32
    %44 = vector.broadcast %cst_12 : f32 to vector<8x1xf32>
    %45 = arith.divf %44, %43 : vector<8x1xf32>
    %46 = vector.broadcast %45 : vector<8x1xf32> to vector<8x512xf32>
    %47 = arith.mulf %41, %46 : vector<8x512xf32>
    %48 = tpu.concatenate %19, %33, %47 in 1 : vector<8x512xf32>, vector<8x512xf32>, vector<8x512xf32> -> vector<8x1536xf32>
    %49 = arith.truncf %48 : vector<8x1536xf32> to vector<8x1536xbf16>
    %c0_13 = arith.constant 0 : index
    %c0_14 = arith.constant 0 : index
    %50 = vector.load %arg2[%c0_13, %c0_14] : memref<1536x256xbf16, #tpu.memory_space<vmem>>, vector<1536x256xbf16>
    %cst_15 = arith.constant dense<0.000000e+00> : vector<8x256xf32>
    %51 = tpu.matmul %49, %50, %cst_15 {dimension_numbers = #tpu.dot_dimension_numbers<[1], [0], [0], [1], [0, 0, 1, 1], [], []>} : vector<8x1536xbf16>, vector<1536x256xbf16>, vector<8x256xf32> -> vector<8x256xf32>
    %c0_16 = arith.constant 0 : index
    %c0_17 = arith.constant 0 : index
    %52 = vector.load %arg3[%c0_16, %c0_17] : memref<1x256xf32, #tpu.memory_space<vmem>>, vector<1x256xf32>
    %53 = vector.broadcast %52 : vector<1x256xf32> to vector<8x256xf32>
    %54 = arith.addf %51, %53 : vector<8x256xf32>
    %cst_18 = arith.constant 0.000000e+00 : f32
    %55 = vector.broadcast %cst_18 : f32 to vector<8x256xf32>
    %56 = arith.cmpf oge, %54, %55 : vector<8x256xf32>
    %cst_19 = arith.constant 0.00999999977 : f32
    %57 = vector.broadcast %cst_19 : f32 to vector<8x256xf32>
    %58 = arith.mulf %57, %54 : vector<8x256xf32>
    %59 = arith.select %56, %54, %58 : vector<8x256xi1>, vector<8x256xf32>
    %c0_20 = arith.constant 0 : index
    %c0_21 = arith.constant 0 : index
    %60 = vector.load %arg4[%c0_20, %c0_21] : memref<256x128xf32, #tpu.memory_space<vmem>>, vector<256x128xf32>
    %cst_22 = arith.constant dense<0.000000e+00> : vector<8x128xf32>
    %61 = tpu.matmul %59, %60, %cst_22 {dimension_numbers = #tpu.dot_dimension_numbers<[1], [0], [0], [1], [0, 0, 1, 1], [], []>} : vector<8x256xf32>, vector<256x128xf32>, vector<8x128xf32> -> vector<8x128xf32>
    %c0_23 = arith.constant 0 : index
    %c0_24 = arith.constant 0 : index
    %62 = vector.load %arg5[%c0_23, %c0_24] : memref<1x128xf32, #tpu.memory_space<vmem>>, vector<1x128xf32>
    %63 = vector.broadcast %62 : vector<1x128xf32> to vector<8x128xf32>
    %64 = arith.addf %61, %63 : vector<8x128xf32>
    %c0_25 = arith.constant 0 : index
    %c0_26 = arith.constant 0 : index
    %65 = vector.load %arg6[%c0_25, %c0_26] : memref<8x128xf32, #tpu.memory_space<vmem>>, vector<8x128xf32>
    tpu.vector_store %arg6[%c0_25, %c0_26], %64 {strides = array<i32>} : memref<8x128xf32, #tpu.memory_space<vmem>>, vector<8x128xf32>,
    return
  }
  func.func @transform_0(%arg0: i32) -> (i32, i32) {
    %c0_i32 = arith.constant 0 : i32
    %c0_i32_0 = arith.constant 0 : i32
    return %arg0, %c0_i32 : i32, i32
  }
  func.func @transform_1(%arg0: i32) -> (i32, i32) {
    %c0_i32 = arith.constant 0 : i32
    %c0_i32_0 = arith.constant 0 : i32
    %c0_i32_1 = arith.constant 0 : i32
    return %c0_i32, %c0_i32_0 : i32, i32
  }
  func.func @transform_2(%arg0: i32) -> (i32, i32) {
    %c0_i32 = arith.constant 0 : i32
    %c0_i32_0 = arith.constant 0 : i32
    %c0_i32_1 = arith.constant 0 : i32
    return %c0_i32, %c0_i32_0 : i32, i32
  }
  func.func @transform_3(%arg0: i32) -> (i32, i32) {
    %c0_i32 = arith.constant 0 : i32
    %c0_i32_0 = arith.constant 0 : i32
    %c0_i32_1 = arith.constant 0 : i32
    return %c0_i32, %c0_i32_0 : i32, i32
  }
  func.func @transform_4(%arg0: i32) -> (i32, i32) {
    %c0_i32 = arith.constant 0 : i32
    %c0_i32_0 = arith.constant 0 : i32
    %c0_i32_1 = arith.constant 0 : i32
    return %c0_i32, %c0_i32_0 : i32, i32
  }
  func.func @transform_5(%arg0: i32) -> (i32, i32) {
    %c0_i32 = arith.constant 0 : i32
    %c0_i32_0 = arith.constant 0 : i32
    return %arg0, %c0_i32 : i32, i32
  }
}

</mosaic_0001>

<bundles_post_ra>
// kernel: cembedder_vf_forward.1
= control target key start
LH: loop header
LB: loop body
LE: loop exit
PB: predicated region body
PF: predicated region fallthrough
CT: control target
= control target key end

     0   :  { %10 = vsyncpa [#allocation3], 0  ;;  %s2514_s0 = inlined_call_operand.vmem [shape: f32[8,3], index: 0, kind: input, shape index: {}]   ;;  %s2515_s1 = inlined_call_operand.hbm [shape: bf16[1536,256], index: 1, kind: input, shape index: {}]   ;;  %s2516_s2 = inlined_call_operand.vmem [shape: f32[1,256], index: 2, kind: input, shape index: {}]   ;;  %s2517_s3 = inlined_call_operand.hbm [shape: f32[256,128], index: 3, kind: input, shape index: {}]   ;;  %s2518_s4 = inlined_call_operand.vmem [shape: f32[1,128], index: 4, kind: input, shape index: {}]   ;;  %s2519_s5 = inlined_call_operand.vmem [shape: f32[8,128], index: 5, kind: output, shape index: {}]  }
   0x1   :  { %11 = vsyncpa [#allocation5], 0  ;;  %s2373_s18 = smov [#allocation2]   ;;  %s2325_s22 = scalar_lea.hbm %s2515_s1, 24576 }
   0x2   :  { %s19_s19 = sshll.u32 %s2373_s18, 4  ;;  %p2326_p0 = scmp.ne.s32.totalorder %s2515_s1, %s2325_s22  ;;  %s20_s19 = int_to_ptr.vmem [resolvable:$true] %s19_s19 }
   0x3   :  { %p2329_p1 = scmp.lt.u32.totalorder %s2325_s22, %s2515_s1 }
   0x5   :  { %p2331_p2 = pnand %p2329_p1, %p2326_p0 }
   0x7   :  { %2334 = shalt.err (!%p2331_p2)
}
   0x8   :  { %s2335_s27 = scalar_lea.vmem %s20_s19, 24576  ;;  %p2340_p4 = scmp.lt.s32.totalorder %s20_s19, %s20_s19 }
   0x9   :  { %p2336_p3 = scmp.ne.s32.totalorder %s20_s19, %s2335_s27  ;;  %p2341_p5 = scmp.lt.s32.totalorder %s2335_s27, %s2335_s27 }
   0xb   :  { %p2342_p6 = por %p2341_p5, %p2340_p4 }
   0xd   :  { %p2343_p7 = pnand %p2342_p6, %p2336_p3 }
   0xf   :  { %2346 = shalt.err (!%p2343_p7)
}
  0x10   :  { %s2374_s28 = smov 128   ;;  %s2375_s29 = smov 8  }
  0x11   :  { %25 = dma.hbm_to_vmem [thread:$0]  %s2515_s1, 24576, %s20_s19, [#allocation3], %s2374_s28, %s2374_s28, %s2375_s29  }
  0x12   :  { %s2376_s7 = smov [#allocation4]   ;;  %s2347_s11 = scalar_lea.hbm %s2517_s3, 4096 }
  0x13   :  { %s33_s8 = sshll.u32 %s2376_s7, 4  ;;  %p2348_p8 = scmp.ne.s32.totalorder %s2517_s3, %s2347_s11  ;;  %s34_s8 = int_to_ptr.vmem [resolvable:$true] %s33_s8 }
  0x14   :  { %p2351_p9 = scmp.lt.u32.totalorder %s2347_s11, %s2517_s3 }
  0x16   :  { %p2353_p10 = pnand %p2351_p9, %p2348_p8 }
  0x18   :  { %2356 = shalt.err (!%p2353_p10)
}
  0x19   :  { %s2357_s16 = scalar_lea.vmem %s34_s8, 4096  ;;  %p2362_p12 = scmp.lt.s32.totalorder %s34_s8, %s34_s8 }
  0x1a   :  { %p2358_p11 = scmp.ne.s32.totalorder %s34_s8, %s2357_s16  ;;  %p2363_p13 = scmp.lt.s32.totalorder %s2357_s16, %s2357_s16 }
  0x1c   :  { %p2364_p0 = por %p2363_p13, %p2362_p12 }
  0x1e   :  { %p2365_p1 = pnand %p2364_p0, %p2358_p11 }
  0x20   :  { %2368 = shalt.err (!%p2365_p1)
}
  0x21   :  { %39 = dma.hbm_to_vmem [thread:$0]  %s2517_s3, 4096, %s34_s8, [#allocation5], %s2374_s28, %s2374_s28, %s2375_s29  }
  0x22   :  { %2369 = dma.done.wait [#allocation3], 24576  }
  0x23   :  { %2370 = vsyncadd [#allocation3], 4294942720 }
  0x24   :  { %2371 = dma.done.wait [#allocation5], 4096  }
  0x25   :  { %2372 = vsyncadd [#allocation5], 4294963200  ;;  %v2377_v0 = vmov 0   ;;  %v2378_v1 = vmov 2   ;;  %v65_v2 = vld [vmem:[%s2514_s0] sm:$0xff]  ;;  %v2379_v3 = vmov 1   ;;  %v48_v51 = vlaneseq }
  0x26   :  { %2003 = vset.pattern.permute.xlu0 %v2377_v0  ;;  %2005 = vset.pattern.permute.xlu1 %v2378_v1  ;;  %v2007_v4 = vld [vmem:[#allocation2 + $0x4] ss:$8 sps:$4 sm:$0xff]   ;;  %v2009_v5 = vld [vmem:[#allocation2] ss:$8 sps:$4 sm:$0xff]   ;;  %v2010_v6 = vld [vmem:[#allocation2 + $0x14] ss:$8 sps:$4 sm:$0xff]  }
  0x27   :  { %68 = vperm.xlu0 %2003, %v65_v2   ;;  %138 = vperm.xlu1 %2005, %v65_v2   ;;  %v2013_v7 = vld [vmem:[#allocation2 + $0x304] ss:$8 sps:$4 sm:$0xff]   ;;  %v2015_v8 = vld [vmem:[#allocation2 + $0x300] ss:$8 sps:$4 sm:$0xff]   ;;  %v2019_v9 = vld [vmem:[#allocation2 + $0x314] ss:$8 sps:$4 sm:$0xff]  }
  0x28   :  { %1348 = vmatprep.subr.bf16.mxu1 %v2007_v4  ;;  %v2012_v10 = vld [vmem:[#allocation2 + $0x10] ss:$8 sps:$4 sm:$0xff]   ;;  %1471 = vmatprep.subr.bf16.mxu0 %v2013_v7  ;;  %v2016_v11 = vld [vmem:[#allocation2 + $0x24] ss:$8 sps:$4 sm:$0xff]   ;;  %v2018_v14 = vld [vmem:[#allocation2 + $0x20] ss:$8 sps:$4 sm:$0xff]  }
  0x29   :  { %1349 = vmatpush1.bf16.msra.mxu1 %v2009_v5  ;;  %1472 = vmatpush1.bf16.msra.mxu0 %v2015_v8  ;;  %v2021_v12 = vld [vmem:[#allocation2 + $0x310] ss:$8 sps:$4 sm:$0xff]   ;;  %v2025_v13 = vld [vmem:[#allocation2 + $0x324] ss:$8 sps:$4 sm:$0xff]   ;;  %v2022_v15 = vld [vmem:[#allocation2 + $0x34] ss:$8 sps:$4 sm:$0xff]  }
  0x2a   :  { %1350 = vmatprep.subr.bf16.mxu1 %v2010_v6  ;;  %1473 = vmatprep.subr.bf16.mxu0 %v2019_v9  ;;  %v2027_v16 = vld [vmem:[#allocation2 + $0x320] ss:$8 sps:$4 sm:$0xff]   ;;  %v2031_v17 = vld [vmem:[#allocation2 + $0x334] ss:$8 sps:$4 sm:$0xff]   ;;  %v2024_v18 = vld [vmem:[#allocation2 + $0x30] ss:$8 sps:$4 sm:$0xff]  }
  0x2b   :  { %2004 = vset.pattern.permute.xlu0 %v2379_v3  ;;  %v2028_v19 = vld [vmem:[#allocation2 + $0x44] ss:$8 sps:$4 sm:$0xff]   ;;  %v2033_v20 = vld [vmem:[#allocation2 + $0x330] ss:$8 sps:$4 sm:$0xff]   ;;  %v2030_v22 = vld [vmem:[#allocation2 + $0x40] ss:$8 sps:$4 sm:$0xff]  }
  0x2c   :  { %103 = vperm.xlu0 %2004, %v65_v2   ;;  %v2037_v21 = vld [vmem:[#allocation2 + $0x344] ss:$8 sps:$4 sm:$0xff]   ;;  %v2034_v23 = vld [vmem:[#allocation2 + $0x54] ss:$8 sps:$4 sm:$0xff]   ;;  %v2039_v24 = vld [vmem:[#allocation2 + $0x340] ss:$8 sps:$4 sm:$0xff]  }
  0x2d   :  { %1351 = vmatpush1.bf16.msra.mxu1 %v2012_v10  ;;  %1474 = vmatpush1.bf16.msra.mxu0 %v2021_v12  ;;  %v2043_v25 = vld [vmem:[#allocation2 + $0x354] ss:$8 sps:$4 sm:$0xff]   ;;  %v2036_v26 = vld [vmem:[#allocation2 + $0x50] ss:$8 sps:$4 sm:$0xff]   ;;  %v2040_v27 = vld [vmem:[#allocation2 + $0x64] ss:$8 sps:$4 sm:$0xff]  }
  0x2e   :  { %1352 = vmatprep.subr.bf16.mxu1 %v2016_v11  ;;  %1475 = vmatprep.subr.bf16.mxu0 %v2025_v13  ;;  %v2045_v28 = vld [vmem:[#allocation2 + $0x350] ss:$8 sps:$4 sm:$0xff]   ;;  %v2049_v29 = vld [vmem:[#allocation2 + $0x364] ss:$8 sps:$4 sm:$0xff]   ;;  %v2042_v30 = vld [vmem:[#allocation2 + $0x60] ss:$8 sps:$4 sm:$0xff]  }
  0x2f   :  { %v2046_v31 = vld [vmem:[#allocation2 + $0x74] ss:$8 sps:$4 sm:$0xff]   ;;  %v2051_v32 = vld [vmem:[#allocation2 + $0x360] ss:$8 sps:$4 sm:$0xff]   ;;  %v2048_v34 = vld [vmem:[#allocation2 + $0x70] ss:$8 sps:$4 sm:$0xff]  }
  0x30   :  { %2006 = vset.pattern.permute.xlu0 %v2378_v1  ;;  %v2055_v33 = vld [vmem:[#allocation2 + $0x374] ss:$8 sps:$4 sm:$0xff]   ;;  %v2052_v35 = vld [vmem:[#allocation2 + $0x84] ss:$8 sps:$4 sm:$0xff]   ;;  %v2057_v36 = vld [vmem:[#allocation2 + $0x370] ss:$8 sps:$4 sm:$0xff]  }
  0x31   :  { %1353 = vmatpush1.bf16.msra.mxu1 %v2018_v14  ;;  %1476 = vmatpush1.bf16.msra.mxu0 %v2027_v16  ;;  %v2061_v37 = vld [vmem:[#allocation2 + $0x384] ss:$8 sps:$4 sm:$0xff]   ;;  %v2054_v38 = vld [vmem:[#allocation2 + $0x80] ss:$8 sps:$4 sm:$0xff]   ;;  %v2058_v39 = vld [vmem:[#allocation2 + $0x94] ss:$8 sps:$4 sm:$0xff]  }
  0x32   :  { %1354 = vmatprep.subr.bf16.mxu1 %v2022_v15  ;;  %1477 = vmatprep.subr.bf16.mxu0 %v2031_v17  ;;  %v2063_v40 = vld [vmem:[#allocation2 + $0x380] ss:$8 sps:$4 sm:$0xff]   ;;  %v2067_v41 = vld [vmem:[#allocation2 + $0x394] ss:$8 sps:$4 sm:$0xff]   ;;  %v2060_v42 = vld [vmem:[#allocation2 + $0x90] ss:$8 sps:$4 sm:$0xff]  }
  0x33   :  { %v2064_v43 = vld [vmem:[#allocation2 + $0xa4] ss:$8 sps:$4 sm:$0xff]   ;;  %v2069_v44 = vld [vmem:[#allocation2 + $0x390] ss:$8 sps:$4 sm:$0xff]   ;;  %v2066_v46 = vld [vmem:[#allocation2 + $0xa0] ss:$8 sps:$4 sm:$0xff]  }
  0x34   :  { %v2073_v45 = vld [vmem:[#allocation2 + $0x3a4] ss:$8 sps:$4 sm:$0xff]   ;;  %v2070_v47 = vld [vmem:[#allocation2 + $0xb4] ss:$8 sps:$4 sm:$0xff]   ;;  %v2075_v48 = vld [vmem:[#allocation2 + $0x3a0] ss:$8 sps:$4 sm:$0xff]  }
  0x35   :  { %1355 = vmatpush1.bf16.msra.mxu1 %v2024_v18  ;;  %1478 = vmatpush1.bf16.msra.mxu0 %v2033_v20  ;;  %v2072_v49 = vld [vmem:[#allocation2 + $0xb0] ss:$8 sps:$4 sm:$0xff]   ;;  %v2076_v50 = vld [vmem:[#allocation2 + $0xc4] ss:$8 sps:$4 sm:$0xff]   ;;  %v49_v52 = vand.u32 127, %v48_v51 }
  0x36   :  { %1356 = vmatprep.subr.bf16.mxu1 %v2028_v19  ;;  %1479 = vmatprep.subr.bf16.mxu0 %v2037_v21 }
  0x37   :  { %v50_v53 = vadd.s32 128, %v49_v52  ;;  %v51_v54 = vadd.s32 256, %v49_v52  ;;  %v52_v55 = vadd.s32 384, %v49_v52  ;;  %v53_v56 = vcvt.s32.f32 %v49_v52 }
  0x39   :  { %1357 = vmatpush1.bf16.msra.mxu1 %v2030_v22  ;;  %1480 = vmatpush1.bf16.msra.mxu0 %v2039_v24  ;;  %v54_v57 = vcvt.s32.f32 %v50_v53  ;;  %v55_v58 = vcvt.s32.f32 %v51_v54  ;;  %v56_v59 = vcvt.s32.f32 %v52_v55  ;;  %v57_v60 = vmul.f32 0.015655577, %v53_v56 }
  0x3a   :  { %1358 = vmatprep.subr.bf16.mxu1 %v2034_v23  ;;  %1481 = vmatprep.subr.bf16.mxu0 %v2043_v25 }
  0x3b   :  { %v58_v61 = vmul.f32 0.015655577, %v54_v57  ;;  %v59_v62 = vmul.f32 0.015655577, %v55_v58  ;;  %v60_v63 = vmul.f32 0.015655577, %v56_v59 }
  0x3c   :  { %v61_v0 = vadd.f32 -4.0, %v57_v60 }
  0x3d   :  { %1359 = vmatpush1.bf16.msra.mxu1 %v2036_v26  ;;  %1482 = vmatpush1.bf16.msra.mxu0 %v2045_v28  ;;  %v62_v1 = vadd.f32 -4.0, %v58_v61  ;;  %v63_v2 = vadd.f32 -4.0, %v59_v62  ;;  %v64_v3 = vadd.f32 -4.0, %v60_v63 }
  0x3e   :  { %1360 = vmatprep.subr.bf16.mxu1 %v2040_v27  ;;  %1483 = vmatprep.subr.bf16.mxu0 %v2049_v29 }
  0x41   :  { %1361 = vmatpush1.bf16.msra.mxu1 %v2042_v30  ;;  %1484 = vmatpush1.bf16.msra.mxu0 %v2051_v32 }
  0x42   :  { %1362 = vmatprep.subr.bf16.mxu1 %v2046_v31  ;;  %1485 = vmatprep.subr.bf16.mxu0 %v2055_v33 }
  0x45   :  { %1363 = vmatpush1.bf16.msra.mxu1 %v2048_v34  ;;  %1486 = vmatpush1.bf16.msra.mxu0 %v2057_v36 }
  0x46   :  { %1364 = vmatprep.subr.bf16.mxu1 %v2052_v35  ;;  %1487 = vmatprep.subr.bf16.mxu0 %v2061_v37 }
  0x49   :  { %1365 = vmatpush1.bf16.msra.mxu1 %v2054_v38  ;;  %1488 = vmatpush1.bf16.msra.mxu0 %v2063_v40 }
  0x4a   :  { %1366 = vmatprep.subr.bf16.mxu1 %v2058_v39  ;;  %1489 = vmatprep.subr.bf16.mxu0 %v2067_v41 }
  0x4d   :  { %1367 = vmatpush1.bf16.msra.mxu1 %v2060_v42  ;;  %1490 = vmatpush1.bf16.msra.mxu0 %v2069_v44 }
  0x4e   :  { %1368 = vmatprep.subr.bf16.mxu1 %v2064_v43  ;;  %1491 = vmatprep.subr.bf16.mxu0 %v2073_v45 }
  0x51   :  { %1369 = vmatpush1.bf16.msra.mxu1 %v2066_v46  ;;  %1492 = vmatpush1.bf16.msra.mxu0 %v2075_v48 }
  0x52   :  { %1370 = vmatprep.subr.bf16.mxu1 %v2070_v47 }
  0x55   :  { %1371 = vmatpush1.bf16.msra.mxu1 %v2072_v49 }
  0x56   :  { %1372 = vmatprep.subr.bf16.mxu1 %v2076_v50 }
  0xa6   :  { %v69_v4 = vpop.permute.xlu0 %68  ;;  %v139_v5 = vpop.permute.xlu1 %138 }
  0xa7   :  { %v71_v6 = vsub.f32 %v61_v0, %v69_v4  ;;  %v72_v7 = vsub.f32 %v62_v1, %v69_v4  ;;  %v73_v8 = vsub.f32 %v63_v2, %v69_v4  ;;  %v74_v9 = vsub.f32 %v64_v3, %v69_v4 }
  0xa8   :  { %v141_v10 = vsub.f32 %v61_v0, %v139_v5  ;;  %v142_v11 = vsub.f32 %v62_v1, %v139_v5  ;;  %v143_v12 = vsub.f32 %v63_v2, %v139_v5  ;;  %v144_v13 = vsub.f32 %v64_v3, %v139_v5 }
  0xa9   :  { %v75_v14 = vmul.f32 -0.5, %v71_v6  ;;  %v76_v15 = vmul.f32 -0.5, %v72_v7  ;;  %v77_v16 = vmul.f32 -0.5, %v73_v8  ;;  %v78_v17 = vmul.f32 -0.5, %v74_v9 }
  0xaa   :  { %v145_v18 = vmul.f32 -0.5, %v141_v10  ;;  %v146_v19 = vmul.f32 -0.5, %v142_v11  ;;  %v147_v20 = vmul.f32 -0.5, %v143_v12  ;;  %v148_v21 = vmul.f32 -0.5, %v144_v13 }
  0xab   :  { %v79_v22 = vmul.f32 %v75_v14, %v71_v6  ;;  %v80_v23 = vmul.f32 %v76_v15, %v72_v7  ;;  %v81_v24 = vmul.f32 %v77_v16, %v73_v8  ;;  %v82_v25 = vmul.f32 %v78_v17, %v74_v9  ;;  %v104_v26 = vpop.permute.xlu0 %103  ;;  %v2079_v14 = vld [vmem:[#allocation2 + $0x3b4] ss:$8 sps:$4 sm:$0xff]   ;;  %v2081_v15 = vld [vmem:[#allocation2 + $0x3b0] ss:$8 sps:$4 sm:$0xff]  }
  0xac   :  { %v149_v27 = vmul.f32 %v145_v18, %v141_v10  ;;  %v150_v28 = vmul.f32 %v146_v19, %v142_v11  ;;  %v151_v29 = vmul.f32 %v147_v20, %v143_v12  ;;  %v152_v30 = vmul.f32 %v148_v21, %v144_v13  ;;  %v2078_v13 = vld [vmem:[#allocation2 + $0xc0] ss:$8 sps:$4 sm:$0xff]   ;;  %v2082_v16 = vld [vmem:[#allocation2 + $0xd4] ss:$8 sps:$4 sm:$0xff]   ;;  %1493 = vmatprep.subr.bf16.mxu0 %v2079_v14  ;;  %v2084_v17 = vld [vmem:[#allocation2 + $0xd0] ss:$8 sps:$4 sm:$0xff]  }
  0xad   :  { %v83_v31 = vmul.f32 1.442695, %v79_v22  ;;  %v85_v32 = vmul.f32 1.442695, %v80_v23  ;;  %v87_v33 = vmul.f32 1.442695, %v81_v24  ;;  %v106_v34 = vsub.f32 %v61_v0, %v104_v26  ;;  %1373 = vmatpush1.bf16.msra.mxu1 %v2078_v13  ;;  %1494 = vmatpush1.bf16.msra.mxu0 %v2081_v15 }
  0xae   :  { %v89_v35 = vmul.f32 1.442695, %v82_v25  ;;  %v107_v36 = vsub.f32 %v62_v1, %v104_v26  ;;  %v153_v37 = vmul.f32 1.442695, %v149_v27  ;;  %v155_v38 = vmul.f32 1.442695, %v150_v28  ;;  %1374 = vmatprep.subr.bf16.mxu1 %v2082_v16 }
  0xaf   :  { %2295 = vpow2.f32 %v83_v31  ;;  %v108_v39 = vsub.f32 %v63_v2, %v104_v26  ;;  %v109_v40 = vsub.f32 %v64_v3, %v104_v26  ;;  %v110_v41 = vmul.f32 -0.5, %v106_v34  ;;  %v2085_v18 = vld [vmem:[#allocation2 + $0x3c4] ss:$8 sps:$4 sm:$0xff]   ;;  %v2087_v19 = vld [vmem:[#allocation2 + $0x3c0] ss:$8 sps:$4 sm:$0xff]  }
  0xb0   :  { %2297 = vpow2.f32 %v85_v32  ;;  %v111_v42 = vmul.f32 -0.5, %v107_v36  ;;  %v157_v43 = vmul.f32 1.442695, %v151_v29  ;;  %v159_v44 = vmul.f32 1.442695, %v152_v30  ;;  %1495 = vmatprep.subr.bf16.mxu0 %v2085_v18 }
  0xb1   :  { %2299 = vpow2.f32 %v87_v33  ;;  %v112_v45 = vmul.f32 -0.5, %v108_v39  ;;  %v113_v46 = vmul.f32 -0.5, %v109_v40  ;;  %v114_v47 = vmul.f32 %v110_v41, %v106_v34  ;;  %1375 = vmatpush1.bf16.msra.mxu1 %v2084_v17  ;;  %v2088_v20 = vld [vmem:[#allocation2 + $0xe4] ss:$8 sps:$4 sm:$0xff]   ;;  %v2090_v21 = vld [vmem:[#allocation2 + $0xe0] ss:$8 sps:$4 sm:$0xff]   ;;  %1496 = vmatpush1.bf16.msra.mxu0 %v2087_v19 }
  0xb2   :  { %2301 = vpow2.f32 %v89_v35  ;;  %v115_v48 = vmul.f32 %v111_v42, %v107_v36  ;;  %v2091_v22 = vld [vmem:[#allocation2 + $0x3d4] ss:$8 sps:$4 sm:$0xff]   ;;  %1376 = vmatprep.subr.bf16.mxu1 %v2088_v20  ;;  %v2093_v24 = vld [vmem:[#allocation2 + $0x3d0] ss:$8 sps:$4 sm:$0xff]   ;;  %v2097_v26 = vld [vmem:[#allocation2 + $0x3e4] ss:$8 sps:$4 sm:$0xff]  }
  0xb3   :  { %2303 = vpow2.f32 %v153_v37  ;;  %v116_v49 = vmul.f32 %v112_v45, %v108_v39  ;;  %v117_v50 = vmul.f32 %v113_v46, %v109_v40  ;;  %v118_v52 = vmul.f32 1.442695, %v114_v47  ;;  %v2094_v23 = vld [vmem:[#allocation2 + $0xf4] ss:$8 sps:$4 sm:$0xff]   ;;  %1497 = vmatprep.subr.bf16.mxu0 %v2091_v22  ;;  %v2096_v25 = vld [vmem:[#allocation2 + $0xf0] ss:$8 sps:$4 sm:$0xff]  }
  0xb4   :  { %2305 = vpow2.f32 %v155_v38  ;;  %v120_v53 = vmul.f32 1.442695, %v115_v48  ;;  %v2099_v27 = vld [vmem:[#allocation2 + $0x3e0] ss:$8 sps:$4 sm:$0xff]   ;;  %v2102_v28 = vld [vmem:[#allocation2 + $0x104] ss:$8 sps:$4 sm:$0xff]  }
  0xb5   :  { %2307 = vpow2.f32 %v157_v43  ;;  %v122_v54 = vmul.f32 1.442695, %v116_v49  ;;  %v124_v55 = vmul.f32 1.442695, %v117_v50  ;;  %1377 = vmatpush1.bf16.msra.mxu1 %v2090_v21  ;;  %1498 = vmatpush1.bf16.msra.mxu0 %v2093_v24  ;;  %v2103_v29 = vld [vmem:[#allocation2 + $0x3f4] ss:$8 sps:$4 sm:$0xff]  }
  0xb6   :  { %2309 = vpow2.f32 %v159_v44  ;;  %1378 = vmatprep.subr.bf16.mxu1 %v2094_v23  ;;  %1499 = vmatprep.subr.bf16.mxu0 %v2097_v26  ;;  %v2105_v30 = vld [vmem:[#allocation2 + $0x3f0] ss:$8 sps:$4 sm:$0xff]   ;;  %v2111_v31 = vld [vmem:[#allocation2 + $0x404] ss:$8 sps:$4 sm:$0xff]   ;;  %v2100_v40 = vld [vmem:[#allocation2 + $0x100] ss:$8 sps:$4 sm:$0xff]  }
  0xb7   :  { %2311 = vpow2.f32 %v118_v52  ;;  %v2108_v42 = vld [vmem:[#allocation2 + $0x114] ss:$8 sps:$4 sm:$0xff]   ;;  %v2106_v45 = vld [vmem:[#allocation2 + $0x110] ss:$8 sps:$4 sm:$0xff]   ;;  %v2114_v47 = vld [vmem:[#allocation2 + $0x124] ss:$8 sps:$4 sm:$0xff]  }
  0xb8   :  { %2313 = vpow2.f32 %v120_v53  ;;  %v2109_v53 = vld [vmem:[#allocation2 + $0x400] ss:$8 sps:$4 sm:$0xff]   ;;  %v2141_v15 = vld [vmem:[#allocation2 + $0x454] ss:$8 sps:$4 sm:$0xff]   ;;  %v2139_v17 = vld [vmem:[#allocation2 + $0x450] ss:$8 sps:$4 sm:$0xff]  }
  0xb9   :  { %v2438_v56 = vpop.eup %2295  ;;  %2315 = vpow2.f32 %v122_v54  ;;  %1379 = vmatpush1.bf16.msra.mxu1 %v2096_v25  ;;  %1500 = vmatpush1.bf16.msra.mxu0 %v2099_v27  ;;  %v2133_v13 = vld [vmem:[#allocation2 + $0x440] ss:$8 sps:$4 sm:$0xff]   ;;  %v2144_v16 = vld [vmem:[#allocation2 + $0x174] ss:$8 sps:$4 sm:$0xff]   ;;  %v2142_v18 = vld [vmem:[#allocation2 + $0x170] ss:$8 sps:$4 sm:$0xff]  }
  0xba   :  { %v2440_v57 = vpop.eup %2297  ;;  %2317 = vpow2.f32 %v124_v55  ;;  %1389 = vmatprep.subr.bf16.mxu1 %v2102_v28  ;;  %1501 = vmatprep.subr.bf16.mxu0 %v2103_v29  ;;  %v2112_v55 = vld [vmem:[#allocation2 + $0x120] ss:$8 sps:$4 sm:$0xff]   ;;  %v2147_v19 = vld [vmem:[#allocation2 + $0x464] ss:$8 sps:$4 sm:$0xff]   ;;  %v2153_v23 = vld [vmem:[#allocation2 + $0x474] ss:$8 sps:$4 sm:$0xff]  }
  0xbb   :  { %v2442_v58 = vpop.eup %2299  ;;  %v91_v59 = vadd.f32 %v2440_v57, %v2438_v56  ;;  %v2136_v14 = vld [vmem:[#allocation2 + $0x160] ss:$8 sps:$4 sm:$0xff]   ;;  %v2150_v20 = vld [vmem:[#allocation2 + $0x184] ss:$8 sps:$4 sm:$0xff]   ;;  %v2156_v24 = vld [vmem:[#allocation2 + $0x194] ss:$8 sps:$4 sm:$0xff]  }
  0xbc   :  { %v2446_v60 = vpop.eup %2301  ;;  %v2145_v21 = vld [vmem:[#allocation2 + $0x460] ss:$8 sps:$4 sm:$0xff]   ;;  %v2151_v25 = vld [vmem:[#allocation2 + $0x470] ss:$8 sps:$4 sm:$0xff]   ;;  %v2159_v27 = vld [vmem:[#allocation2 + $0x484] ss:$8 sps:$4 sm:$0xff]  }
  0xbd   :  { %v2448_v61 = vpop.eup %2303  ;;  %v92_v62 = vadd.f32 %v2442_v58, %v91_v59  ;;  %1502 = vmatpush1.bf16.msra.mxu0 %v2105_v30  ;;  %v2120_v59 = vld [vmem:[#allocation2 + $0x134] ss:$8 sps:$4 sm:$0xff]   ;;  %v2148_v22 = vld [vmem:[#allocation2 + $0x180] ss:$8 sps:$4 sm:$0xff]   ;;  %v2154_v26 = vld [vmem:[#allocation2 + $0x190] ss:$8 sps:$4 sm:$0xff]  }
  0xbe   :  { %v2451_v63 = vpop.eup %2305  ;;  %1512 = vmatprep.subr.bf16.mxu0 %v2111_v31  ;;  %v2162_v28 = vld [vmem:[#allocation2 + $0x1a4] ss:$8 sps:$4 sm:$0xff]   ;;  %v2157_v29 = vld [vmem:[#allocation2 + $0x480] ss:$8 sps:$4 sm:$0xff]   ;;  %v2165_v31 = vld [vmem:[#allocation2 + $0x494] ss:$8 sps:$4 sm:$0xff]  }
  0xbf   :  { %v2453_v0 = vpop.eup %2307  ;;  %v93_v1 = vadd.f32 %v2446_v60, %v92_v62  ;;  %v161_v2 = vadd.f32 %v2451_v63, %v2448_v61  ;;  %v2118_v62 = vld [vmem:[#allocation2 + $0x130] ss:$8 sps:$4 sm:$0xff]   ;;  %v2160_v30 = vld [vmem:[#allocation2 + $0x1a0] ss:$8 sps:$4 sm:$0xff]  }
  0xc0   :  { %v2458_v3 = vpop.eup %2309 }
  0xc1   :  { %v2460_v4 = vpop.eup %2311  ;;  %94 = vadd.xlane.f32.xlu1 %v93_v1  ;;  %v162_v5 = vadd.f32 %v2453_v0, %v161_v2  ;;  %v2123_v1 = vld [vmem:[#allocation2 + $0x424] ss:$8 sps:$4 sm:$0xff]   ;;  %v2121_v2 = vld [vmem:[#allocation2 + $0x420] ss:$8 sps:$4 sm:$0xff]  }
  0xc2   :  { %v2463_v6 = vpop.eup %2313 }
  0xc3   :  { %v163_v7 = vadd.f32 %v2458_v3, %v162_v5  ;;  %v126_v8 = vadd.f32 %v2463_v6, %v2460_v4  ;;  %v2468_v9 = vpop.eup %2315  ;;  %v2124_v5 = vld [vmem:[#allocation2 + $0x140] ss:$8 sps:$4 sm:$0xff]  }
  0xc4   :  { %v2471_v11 = vpop.eup %2317 }
  0xc5   :  { %164 = vadd.xlane.f32.xlu1 %v163_v7  ;;  %v127_v10 = vadd.f32 %v2468_v9, %v126_v8  ;;  %v2129_v7 = vld [vmem:[#allocation2 + $0x434] ss:$8 sps:$4 sm:$0xff]  }
  0xc6   :  { %v2132_v8 = vld [vmem:[#allocation2 + $0x154] ss:$8 sps:$4 sm:$0xff]  }
  0xc7   :  { %v128_v12 = vadd.f32 %v2471_v11, %v127_v10  ;;  %v2130_v10 = vld [vmem:[#allocation2 + $0x150] ss:$8 sps:$4 sm:$0xff]  }
  0xc9   :  { %129 = vadd.xlane.f32.xlu0 %v128_v12  ;;  %v2138_v12 = vld [vmem:[#allocation2 + $0x164] ss:$8 sps:$4 sm:$0xff]  }
 0x14e   :  { %v95_v32 = vpop.xlane.xlu1 %94 }
 0x14f   :  { %2319 = vrcp.f32 %v95_v32  ;;  %v2168_v32 = vld [vmem:[#allocation2 + $0x1b4] ss:$8 sps:$4 sm:$0xff]  }
 0x152   :  { %v165_v33 = vpop.xlane.xlu1 %164 }
 0x153   :  { %2321 = vrcp.f32 %v165_v33  ;;  %v2163_v33 = vld [vmem:[#allocation2 + $0x490] ss:$8 sps:$4 sm:$0xff]  }
 0x156   :  { %v130_v34 = vpop.xlane.xlu0 %129 }
 0x157   :  { %2323 = vrcp.f32 %v130_v34  ;;  %v2166_v34 = vld [vmem:[#allocation2 + $0x1b0] ss:$8 sps:$4 sm:$0xff]  }
 0x159   :  { %v2474_v35 = vpop.eup %2319 }
 0x15a   :  { %v99_v36 = vmul.f32 %v2474_v35, %v2440_v57  ;;  %v98_v37 = vmul.f32 %v2474_v35, %v2438_v56  ;;  %v101_v38 = vmul.f32 %v2474_v35, %v2446_v60  ;;  %v2117_v56 = vld [vmem:[#allocation2 + $0x414] ss:$8 sps:$4 sm:$0xff]   ;;  %v2115_v60 = vld [vmem:[#allocation2 + $0x410] ss:$8 sps:$4 sm:$0xff]  }
 0x15c   :  { %v173_v39 = vpack.c.bf16 %v99_v36, %v99_v36  ;;  %v172_v41 = vpack.c.bf16 %v98_v37, %v98_v37  ;;  %v175_v43 = vpack.c.bf16 %v101_v38, %v101_v38  ;;  %v2171_v36 = vld [vmem:[#allocation2 + $0x4a4] ss:$8 sps:$4 sm:$0xff]   ;;  %v2169_v38 = vld [vmem:[#allocation2 + $0x4a0] ss:$8 sps:$4 sm:$0xff]  }
 0x15d   :  { %v2482_v44 = vpop.eup %2321  ;;  %v2174_v37 = vld [vmem:[#allocation2 + $0x1c4] ss:$8 sps:$4 sm:$0xff]  }
 0x15e   :  { %1380 = vmatprep.mubr.bf16.mxu1 %v173_v39  ;;  %v169_v50 = vmul.f32 %v2482_v44, %v2451_v63  ;;  %v2126_v63 = vld [vmem:[#allocation2 + $0x144] ss:$8 sps:$4 sm:$0xff]   ;;  %v2172_v39 = vld [vmem:[#allocation2 + $0x1c0] ss:$8 sps:$4 sm:$0xff]  }
 0x15f   :  { %1381 = vmatmul.mubr.bf16.vlgmr.msra.gmra.mrb[0].mxu1 %v172_v41  ;;  %v2180_v41 = vld [vmem:[#allocation2 + $0x1d4] ss:$8 sps:$4 sm:$0xff]  }
 0x160   :  { %1390 = vmatpush1.bf16.msra.mxu1 %v2100_v40  ;;  %1421 = vmatprep.mubr.bf16.mxu1 %v175_v43  ;;  %v181_v57 = vpack.c.bf16 %v169_v50, %v169_v50  ;;  %v2177_v40 = vld [vmem:[#allocation2 + $0x4b4] ss:$8 sps:$4 sm:$0xff]   ;;  %v2178_v43 = vld [vmem:[#allocation2 + $0x1d0] ss:$8 sps:$4 sm:$0xff]  }
 0x161   :  { %v2484_v46 = vpop.eup %2323  ;;  %1391 = vmatprep.subr.bf16.mxu1 %v2108_v42  ;;  %v2175_v42 = vld [vmem:[#allocation2 + $0x4b0] ss:$8 sps:$4 sm:$0xff]   ;;  %v2189_v50 = vld [vmem:[#allocation2 + $0x4d4] ss:$8 sps:$4 sm:$0xff]  }
 0x162   :  { %v136_v48 = vmul.f32 %v2484_v46, %v2471_v11  ;;  %v135_v49 = vmul.f32 %v2484_v46, %v2468_v9  ;;  %v2127_v9 = vld [vmem:[#allocation2 + $0x430] ss:$8 sps:$4 sm:$0xff]   ;;  %v2135_v11 = vld [vmem:[#allocation2 + $0x444] ss:$8 sps:$4 sm:$0xff]  }
 0x164   :  { %1392 = vmatpush1.bf16.msra.mxu1 %v2106_v45  ;;  %v179_v52 = vpack.c.bf16 %v136_v48, %v136_v48  ;;  %v178_v54 = vpack.c.bf16 %v135_v49, %v135_v49  ;;  %v2183_v45 = vld [vmem:[#allocation2 + $0x4c4] ss:$8 sps:$4 sm:$0xff]   ;;  %v2181_v48 = vld [vmem:[#allocation2 + $0x4c0] ss:$8 sps:$4 sm:$0xff]  }
 0x165   :  { %1393 = vmatprep.subr.bf16.mxu1 %v2114_v47  ;;  %v2186_v47 = vld [vmem:[#allocation2 + $0x1e4] ss:$8 sps:$4 sm:$0xff]   ;;  %v2184_v49 = vld [vmem:[#allocation2 + $0x1e0] ss:$8 sps:$4 sm:$0xff]  }
 0x166   :  { %1503 = vmatprep.mubr.bf16.mxu0 %v179_v52  ;;  %v2192_v52 = vld [vmem:[#allocation2 + $0x1f4] ss:$8 sps:$4 sm:$0xff]  }
 0x167   :  { %1504 = vmatmul.mubr.bf16.vlgmr.msra.gmra.mrb[0].mxu0 %v178_v54  ;;  %v2190_v54 = vld [vmem:[#allocation2 + $0x1f0] ss:$8 sps:$4 sm:$0xff]  }
 0x168   :  { %1513 = vmatpush1.bf16.msra.mxu0 %v2109_v53  ;;  %1544 = vmatprep.mubr.bf16.mxu0 %v181_v57  ;;  %v2187_v53 = vld [vmem:[#allocation2 + $0x4d0] ss:$8 sps:$4 sm:$0xff]   ;;  %v2198_v57 = vld [vmem:[#allocation2 + $0x204] ss:$8 sps:$4 sm:$0xff]  }
 0x169   :  { %1394 = vmatpush1.bf16.msra.mxu1 %v2112_v55  ;;  %1514 = vmatprep.subr.bf16.mxu0 %v2117_v56  ;;  %v2195_v55 = vld [vmem:[#allocation2 + $0x4e4] ss:$8 sps:$4 sm:$0xff]   ;;  %v100_v56 = vmul.f32 %v2474_v35, %v2442_v58  ;;  %v2202_v58 = vld [vmem:[#allocation2 + $0x210] ss:$8 sps:$4 sm:$0xff]   ;;  %v168_v35 = vmul.f32 %v2482_v44, %v2448_v61 }
 0x16a   :  { %1395 = vmatprep.subr.bf16.mxu1 %v2120_v59  ;;  %v134_v59 = vmul.f32 %v2484_v46, %v2463_v6  ;;  %v2207_v6 = vld [vmem:[#allocation2 + $0x504] ss:$8 sps:$4 sm:$0xff]   ;;  %v2211_v61 = vld [vmem:[#allocation2 + $0x510] ss:$8 sps:$4 sm:$0xff]  }
 0x16c   :  { %1515 = vmatpush1.bf16.msra.mxu0 %v2115_v60  ;;  %v2193_v60 = vld [vmem:[#allocation2 + $0x4e0] ss:$8 sps:$4 sm:$0xff]  }
 0x16d   :  { %1396 = vmatpush1.bf16.msra.mxu1 %v2118_v62  ;;  %1516 = vmatprep.subr.bf16.mxu0 %v2123_v1  ;;  %v2196_v62 = vld [vmem:[#allocation2 + $0x200] ss:$8 sps:$4 sm:$0xff]   ;;  %v174_v1 = vpack.c.bf16 %v100_v56, %v100_v56  ;;  %v2273_v56 = vld [vmem:[#allocation2 + $0x5b4] ss:$8 sps:$4 sm:$0xff]  }
 0x16e   :  { %1397 = vmatprep.subr.bf16.mxu1 %v2126_v63  ;;  %v2201_v63 = vld [vmem:[#allocation2 + $0x4f4] ss:$8 sps:$4 sm:$0xff]  }
 0x170   :  { %1517 = vmatpush1.bf16.msra.mxu0 %v2121_v2  ;;  %v2204_v2 = vld [vmem:[#allocation2 + $0x214] ss:$8 sps:$4 sm:$0xff]  }
 0x171   :  { %1398 = vmatpush1.bf16.msra.mxu1 %v2124_v5  ;;  %1518 = vmatprep.subr.bf16.mxu0 %v2129_v7  ;;  %v177_v5 = vpack.c.bf16 %v134_v59, %v134_v59  ;;  %v2199_v7 = vld [vmem:[#allocation2 + $0x4f0] ss:$8 sps:$4 sm:$0xff]  }
 0x172   :  { %1399 = vmatprep.subr.bf16.mxu1 %v2132_v8  ;;  %v171_v8 = vmul.f32 %v2482_v44, %v2458_v3  ;;  %v2222_v3 = vld [vmem:[#allocation2 + $0x244] ss:$8 sps:$4 sm:$0xff]   ;;  %v2271_v59 = vld [vmem:[#allocation2 + $0x5b0] ss:$8 sps:$4 sm:$0xff]  }
 0x174   :  { %1519 = vmatpush1.bf16.msra.mxu0 %v2127_v9  ;;  %v2210_v9 = vld [vmem:[#allocation2 + $0x224] ss:$8 sps:$4 sm:$0xff]  }
 0x175   :  { %1400 = vmatpush1.bf16.msra.mxu1 %v2130_v10  ;;  %1520 = vmatprep.subr.bf16.mxu0 %v2135_v11  ;;  %v2205_v10 = vld [vmem:[#allocation2 + $0x500] ss:$8 sps:$4 sm:$0xff]   ;;  %v180_v11 = vpack.c.bf16 %v168_v35, %v168_v35 }
 0x176   :  { %1401 = vmatprep.subr.bf16.mxu1 %v2138_v12  ;;  %v2208_v12 = vld [vmem:[#allocation2 + $0x220] ss:$8 sps:$4 sm:$0xff]  }
 0x177   :  { %v1617_v35 = vld [vmem:[#allocation4 + $0x88] sm:$0xff] }
 0x178   :  { %1521 = vmatpush1.bf16.msra.mxu0 %v2133_v13  ;;  %v2213_v13 = vld [vmem:[#allocation2 + $0x514] ss:$8 sps:$4 sm:$0xff]  }
 0x179   :  { %1402 = vmatpush1.bf16.msra.mxu1 %v2136_v14  ;;  %1522 = vmatprep.subr.bf16.mxu0 %v2141_v15  ;;  %v183_v14 = vpack.c.bf16 %v171_v8, %v171_v8  ;;  %v2216_v15 = vld [vmem:[#allocation2 + $0x234] ss:$8 sps:$4 sm:$0xff]   ;;  %v2286_v8 = vld [vmem:[#allocation2 + $0x2f0] ss:$8 sps:$4 sm:$0xff]  }
 0x17a   :  { %1403 = vmatprep.subr.bf16.mxu1 %v2144_v16  ;;  %v2214_v16 = vld [vmem:[#allocation2 + $0x230] ss:$8 sps:$4 sm:$0xff]  }
 0x17c   :  { %1523 = vmatpush1.bf16.msra.mxu0 %v2139_v17  ;;  %v2219_v17 = vld [vmem:[#allocation2 + $0x524] ss:$8 sps:$4 sm:$0xff]  }
 0x17d   :  { %1404 = vmatpush1.bf16.msra.mxu1 %v2142_v18  ;;  %1524 = vmatprep.subr.bf16.mxu0 %v2147_v19  ;;  %v2217_v18 = vld [vmem:[#allocation2 + $0x520] ss:$8 sps:$4 sm:$0xff]  }
 0x17e   :  { %1405 = vmatprep.subr.bf16.mxu1 %v2150_v20  ;;  %v2220_v19 = vld [vmem:[#allocation2 + $0x240] ss:$8 sps:$4 sm:$0xff]   ;;  %v2225_v20 = vld [vmem:[#allocation2 + $0x534] ss:$8 sps:$4 sm:$0xff]  }
 0x180   :  { %1525 = vmatpush1.bf16.msra.mxu0 %v2145_v21  ;;  %v2228_v21 = vld [vmem:[#allocation2 + $0x254] ss:$8 sps:$4 sm:$0xff]  }
 0x181   :  { %1406 = vmatpush1.bf16.msra.mxu1 %v2148_v22  ;;  %1526 = vmatprep.subr.bf16.mxu0 %v2153_v23  ;;  %v2223_v22 = vld [vmem:[#allocation2 + $0x530] ss:$8 sps:$4 sm:$0xff]  }
 0x182   :  { %1407 = vmatprep.subr.bf16.mxu1 %v2156_v24  ;;  %v2226_v23 = vld [vmem:[#allocation2 + $0x250] ss:$8 sps:$4 sm:$0xff]   ;;  %v2231_v24 = vld [vmem:[#allocation2 + $0x544] ss:$8 sps:$4 sm:$0xff]  }
 0x184   :  { %1527 = vmatpush1.bf16.msra.mxu0 %v2151_v25  ;;  %v2234_v25 = vld [vmem:[#allocation2 + $0x264] ss:$8 sps:$4 sm:$0xff]  }
 0x185   :  { %1408 = vmatpush1.bf16.msra.mxu1 %v2154_v26  ;;  %1528 = vmatprep.subr.bf16.mxu0 %v2159_v27  ;;  %v2229_v26 = vld [vmem:[#allocation2 + $0x540] ss:$8 sps:$4 sm:$0xff]  }
 0x186   :  { %1409 = vmatprep.subr.bf16.mxu1 %v2162_v28  ;;  %v2232_v27 = vld [vmem:[#allocation2 + $0x260] ss:$8 sps:$4 sm:$0xff]   ;;  %v2237_v28 = vld [vmem:[#allocation2 + $0x554] ss:$8 sps:$4 sm:$0xff]  }
 0x188   :  { %1529 = vmatpush1.bf16.msra.mxu0 %v2157_v29  ;;  %v2240_v29 = vld [vmem:[#allocation2 + $0x274] ss:$8 sps:$4 sm:$0xff]  }
 0x189   :  { %1410 = vmatpush1.bf16.msra.mxu1 %v2160_v30  ;;  %1530 = vmatprep.subr.bf16.mxu0 %v2165_v31  ;;  %v2235_v30 = vld [vmem:[#allocation2 + $0x550] ss:$8 sps:$4 sm:$0xff]  }
 0x18a   :  { %1411 = vmatprep.subr.bf16.mxu1 %v2168_v32  ;;  %v2238_v31 = vld [vmem:[#allocation2 + $0x270] ss:$8 sps:$4 sm:$0xff]   ;;  %v2243_v32 = vld [vmem:[#allocation2 + $0x564] ss:$8 sps:$4 sm:$0xff]  }
 0x18c   :  { %1531 = vmatpush1.bf16.msra.mxu0 %v2163_v33  ;;  %v2246_v33 = vld [vmem:[#allocation2 + $0x284] ss:$8 sps:$4 sm:$0xff]  }
 0x18d   :  { %1412 = vmatpush1.bf16.msra.mxu1 %v2166_v34  ;;  %1532 = vmatprep.subr.bf16.mxu0 %v2171_v36  ;;  %v2241_v34 = vld [vmem:[#allocation2 + $0x560] ss:$8 sps:$4 sm:$0xff]  }
 0x18e   :  { %1413 = vmatprep.subr.bf16.mxu1 %v2174_v37  ;;  %v2244_v36 = vld [vmem:[#allocation2 + $0x280] ss:$8 sps:$4 sm:$0xff]   ;;  %v2249_v37 = vld [vmem:[#allocation2 + $0x574] ss:$8 sps:$4 sm:$0xff]  }
 0x190   :  { %1533 = vmatpush1.bf16.msra.mxu0 %v2169_v38  ;;  %v2252_v38 = vld [vmem:[#allocation2 + $0x294] ss:$8 sps:$4 sm:$0xff]  }
 0x191   :  { %1414 = vmatpush1.bf16.msra.mxu1 %v2172_v39  ;;  %1534 = vmatprep.subr.bf16.mxu0 %v2177_v40  ;;  %v2247_v39 = vld [vmem:[#allocation2 + $0x570] ss:$8 sps:$4 sm:$0xff]  }
 0x192   :  { %1415 = vmatprep.subr.bf16.mxu1 %v2180_v41  ;;  %v2250_v40 = vld [vmem:[#allocation2 + $0x290] ss:$8 sps:$4 sm:$0xff]   ;;  %v2255_v41 = vld [vmem:[#allocation2 + $0x584] ss:$8 sps:$4 sm:$0xff]  }
 0x194   :  { %1535 = vmatpush1.bf16.msra.mxu0 %v2175_v42  ;;  %v2258_v42 = vld [vmem:[#allocation2 + $0x2a4] ss:$8 sps:$4 sm:$0xff]  }
 0x195   :  { %1416 = vmatpush1.bf16.msra.mxu1 %v2178_v43  ;;  %1536 = vmatprep.subr.bf16.mxu0 %v2183_v45  ;;  %v2253_v43 = vld [vmem:[#allocation2 + $0x580] ss:$8 sps:$4 sm:$0xff]  }
 0x196   :  { %1417 = vmatprep.subr.bf16.mxu1 %v2186_v47  ;;  %v2256_v45 = vld [vmem:[#allocation2 + $0x2a0] ss:$8 sps:$4 sm:$0xff]   ;;  %v2261_v47 = vld [vmem:[#allocation2 + $0x594] ss:$8 sps:$4 sm:$0xff]  }
 0x198   :  { %1537 = vmatpush1.bf16.msra.mxu0 %v2181_v48  ;;  %v2264_v48 = vld [vmem:[#allocation2 + $0x2b4] ss:$8 sps:$4 sm:$0xff]  }
 0x199   :  { %1418 = vmatpush1.bf16.msra.mxu1 %v2184_v49  ;;  %1538 = vmatprep.subr.bf16.mxu0 %v2189_v50  ;;  %v2259_v49 = vld [vmem:[#allocation2 + $0x590] ss:$8 sps:$4 sm:$0xff]  }
 0x19a   :  { %1419 = vmatprep.subr.bf16.mxu1 %v2192_v52  ;;  %v2262_v50 = vld [vmem:[#allocation2 + $0x2b0] ss:$8 sps:$4 sm:$0xff]   ;;  %v2267_v52 = vld [vmem:[#allocation2 + $0x5a4] ss:$8 sps:$4 sm:$0xff]  }
 0x19c   :  { %1539 = vmatpush1.bf16.msra.mxu0 %v2187_v53  ;;  %v2270_v53 = vld [vmem:[#allocation2 + $0x2c4] ss:$8 sps:$4 sm:$0xff]  }
 0x19d   :  { %1420 = vmatpush1.bf16.msra.mxu1 %v2190_v54  ;;  %1540 = vmatprep.subr.bf16.mxu0 %v2195_v55  ;;  %v2265_v54 = vld [vmem:[#allocation2 + $0x5a0] ss:$8 sps:$4 sm:$0xff]  }
 0x19e   :  { %1430 = vmatprep.subr.bf16.mxu1 %v2198_v57  ;;  %v2268_v55 = vld [vmem:[#allocation2 + $0x2c0] ss:$8 sps:$4 sm:$0xff]   ;;  %v2276_v57 = vld [vmem:[#allocation2 + $0x2d4] ss:$8 sps:$4 sm:$0xff]  }
 0x1a0   :  { %1541 = vmatpush1.bf16.msra.mxu0 %v2193_v60  ;;  %1422 = vmatmul.mubr.bf16.vlgmr.msra.gmra.mrb[0].mxu1 %v174_v1  ;;  %v2274_v60 = vld [vmem:[#allocation2 + $0x2d0] ss:$8 sps:$4 sm:$0xff]   ;;  %v2282_v1 = vld [vmem:[#allocation2 + $0x2e4] ss:$8 sps:$4 sm:$0xff]  }
 0x1a1   :  { %1431 = vmatpush1.bf16.msra.mxu1 %v2196_v62  ;;  %1462 = vmatprep.mubr.bf16.mxu1 %v177_v5  ;;  %v2279_v62 = vld [vmem:[#allocation2 + $0x5c4] ss:$8 sps:$4 sm:$0xff]   ;;  %v2285_v5 = vld [vmem:[#allocation2 + $0x5d4] ss:$8 sps:$4 sm:$0xff]  }
 0x1a2   :  { %1542 = vmatprep.subr.bf16.mxu0 %v2201_v63  ;;  %1432 = vmatprep.subr.bf16.mxu1 %v2204_v2  ;;  %v2277_v63 = vld [vmem:[#allocation2 + $0x5c0] ss:$8 sps:$4 sm:$0xff]  }
 0x1a3   :  { %v2280_v2 = vld [vmem:[#allocation2 + $0x2e0] ss:$8 sps:$4 sm:$0xff]  }
 0x1a4   :  { %1543 = vmatpush1.bf16.msra.mxu0 %v2199_v7  ;;  %v2288_v7 = vld [vmem:[#allocation2 + $0x2f4] ss:$8 sps:$4 sm:$0xff]  }
 0x1a5   :  { %1433 = vmatpush1.bf16.msra.mxu1 %v2202_v58  ;;  %1553 = vmatprep.subr.bf16.mxu0 %v2207_v6  ;;  %v1616_v58 = vld [vmem:[#allocation4 + $0x80] sm:$0xff]  ;;  %v2283_v6 = vld [vmem:[#allocation2 + $0x5d0] ss:$8 sps:$4 sm:$0xff]  }
 0x1a6   :  { %1434 = vmatprep.subr.bf16.mxu1 %v2210_v9  ;;  %v2291_v9 = vld [vmem:[#allocation2 + $0x5e4] ss:$8 sps:$4 sm:$0xff]  }
 0x1a7   :  { %1545 = vmatmul.mubr.bf16.vlgmr.msra.gmra.mrb[0].mxu0 %v180_v11  ;;  %v1944_v11 = vpack.c.bf16 %v1617_v35, %v1616_v58 }
 0x1a8   :  { %1554 = vmatpush1.bf16.msra.mxu0 %v2205_v10  ;;  %1585 = vmatprep.mubr.bf16.mxu0 %v183_v14  ;;  %v133_v10 = vmul.f32 %v2484_v46, %v2460_v4  ;;  %v1618_v14 = vld [vmem:[#allocation4 + $0x90] sm:$0xff]  ;;  %v170_v46 = vmul.f32 %v2482_v44, %v2453_v0 }
 0x1a9   :  { %1435 = vmatpush1.bf16.msra.mxu1 %v2208_v12  ;;  %1555 = vmatprep.subr.bf16.mxu0 %v2213_v13  ;;  %v1600_v12 = vld [vmem:[#allocation4] sm:$0xff]  ;;  %v1601_v13 = vld [vmem:[#allocation4 + $0x8] sm:$0xff]  ;;  %v2292_v4 = vld [vmem:[#allocation2 + $0x5f0] ss:$8 sps:$4 sm:$0xff]  }
 0x1aa   :  { %1436 = vmatprep.subr.bf16.mxu1 %v2216_v15  ;;  %v1619_v15 = vld [vmem:[#allocation4 + $0x98] sm:$0xff] }
 0x1ac   :  { %1556 = vmatpush1.bf16.msra.mxu0 %v2211_v61  ;;  %v2289_v61 = vld [vmem:[#allocation2 + $0x5e0] ss:$8 sps:$4 sm:$0xff]  }
 0x1ad   :  { %1437 = vmatpush1.bf16.msra.mxu1 %v2214_v16  ;;  %1557 = vmatprep.subr.bf16.mxu0 %v2219_v17  ;;  %v2294_v16 = vld [vmem:[#allocation2 + $0x5f4] ss:$8 sps:$4 sm:$0xff]   ;;  %v1946_v17 = vpack.c.bf16 %v1601_v13, %v1600_v12 }
 0x1ae   :  { %1438 = vmatprep.subr.bf16.mxu1 %v2222_v3  ;;  %v176_v3 = vpack.c.bf16 %v133_v10, %v133_v10 }
 0x1b0   :  { %1558 = vmatpush1.bf16.msra.mxu0 %v2217_v18  ;;  %v1948_v18 = vpack.c.bf16 %v1619_v15, %v1618_v14 }
 0x1b1   :  { %1439 = vmatpush1.bf16.msra.mxu1 %v2220_v19  ;;  %1559 = vmatprep.subr.bf16.mxu0 %v2225_v20  ;;  %v1602_v19 = vld [vmem:[#allocation4 + $0x10] sm:$0xff]  ;;  %v1603_v20 = vld [vmem:[#allocation4 + $0x18] sm:$0xff] }
 0x1b2   :  { %1440 = vmatprep.subr.bf16.mxu1 %v2228_v21  ;;  %v1620_v21 = vld [vmem:[#allocation4 + $0xa0] sm:$0xff] }
 0x1b4   :  { %1560 = vmatpush1.bf16.msra.mxu0 %v2223_v22  ;;  %v1621_v22 = vld [vmem:[#allocation4 + $0xa8] sm:$0xff] }
 0x1b5   :  { %1441 = vmatpush1.bf16.msra.mxu1 %v2226_v23  ;;  %1561 = vmatprep.subr.bf16.mxu0 %v2231_v24  ;;  %v1950_v23 = vpack.c.bf16 %v1603_v20, %v1602_v19  ;;  %v1952_v24 = vpack.c.bf16 %v1621_v22, %v1620_v21  ;;  %v1908_v20 = vld [vmem:[%s2518_s4] ss:$0 sm:$0xff] }
 0x1b6   :  { %1442 = vmatprep.subr.bf16.mxu1 %v2234_v25  ;;  %v1604_v25 = vld [vmem:[#allocation4 + $0x20] sm:$0xff] }
 0x1b8   :  { %1562 = vmatpush1.bf16.msra.mxu0 %v2229_v26  ;;  %v1605_v26 = vld [vmem:[#allocation4 + $0x28] sm:$0xff] }
 0x1b9   :  { %1443 = vmatpush1.bf16.msra.mxu1 %v2232_v27  ;;  %1563 = vmatprep.subr.bf16.mxu0 %v2237_v28  ;;  %v1622_v27 = vld [vmem:[#allocation4 + $0xb0] sm:$0xff]  ;;  %v1623_v28 = vld [vmem:[#allocation4 + $0xb8] sm:$0xff] }
 0x1ba   :  { %1444 = vmatprep.subr.bf16.mxu1 %v2240_v29  ;;  %v182_v29 = vpack.c.bf16 %v170_v46, %v170_v46 }
 0x1bc   :  { %1564 = vmatpush1.bf16.msra.mxu0 %v2235_v30  ;;  %v1954_v30 = vpack.c.bf16 %v1605_v26, %v1604_v25 }
 0x1bd   :  { %1445 = vmatpush1.bf16.msra.mxu1 %v2238_v31  ;;  %1565 = vmatprep.subr.bf16.mxu0 %v2243_v32  ;;  %v1956_v31 = vpack.c.bf16 %v1623_v28, %v1622_v27  ;;  %v1606_v32 = vld [vmem:[#allocation4 + $0x30] sm:$0xff] }
 0x1be   :  { %1446 = vmatprep.subr.bf16.mxu1 %v2246_v33  ;;  %v1607_v33 = vld [vmem:[#allocation4 + $0x38] sm:$0xff] }
 0x1bf   :  { %v1958_v0 = vpack.c.bf16 %v1607_v33, %v1606_v32 }
 0x1c0   :  { %1566 = vmatpush1.bf16.msra.mxu0 %v2241_v34  ;;  %v1624_v34 = vld [vmem:[#allocation4 + $0xc0] sm:$0xff] }
 0x1c1   :  { %1447 = vmatpush1.bf16.msra.mxu1 %v2244_v36  ;;  %1567 = vmatprep.subr.bf16.mxu0 %v2249_v37  ;;  %v1625_v36 = vld [vmem:[#allocation4 + $0xc8] sm:$0xff]  ;;  %v1608_v37 = vld [vmem:[#allocation4 + $0x40] sm:$0xff] }
 0x1c2   :  { %1448 = vmatprep.subr.bf16.mxu1 %v2252_v38  ;;  %v1960_v44 = vpack.c.bf16 %v1625_v36, %v1624_v34  ;;  %v1609_v38 = vld [vmem:[#allocation4 + $0x48] sm:$0xff] }
 0x1c4   :  { %1568 = vmatpush1.bf16.msra.mxu0 %v2247_v39  ;;  %v1962_v39 = vpack.c.bf16 %v1609_v38, %v1608_v37 }
 0x1c5   :  { %1449 = vmatpush1.bf16.msra.mxu1 %v2250_v40  ;;  %1569 = vmatprep.subr.bf16.mxu0 %v2255_v41  ;;  %v1626_v40 = vld [vmem:[#allocation4 + $0xd0] sm:$0xff]  ;;  %v1627_v41 = vld [vmem:[#allocation4 + $0xd8] sm:$0xff] }
 0x1c6   :  { %1450 = vmatprep.subr.bf16.mxu1 %v2258_v42  ;;  %v1964_v42 = vpack.c.bf16 %v1627_v41, %v1626_v40 }
 0x1c8   :  { %1570 = vmatpush1.bf16.msra.mxu0 %v2253_v43  ;;  %v1610_v43 = vld [vmem:[#allocation4 + $0x50] sm:$0xff] }
 0x1c9   :  { %1451 = vmatpush1.bf16.msra.mxu1 %v2256_v45  ;;  %1571 = vmatprep.subr.bf16.mxu0 %v2261_v47  ;;  %v1611_v45 = vld [vmem:[#allocation4 + $0x58] sm:$0xff] }
 0x1ca   :  { %1452 = vmatprep.subr.bf16.mxu1 %v2264_v48  ;;  %v1966_v47 = vpack.c.bf16 %v1611_v45, %v1610_v43  ;;  %v1628_v48 = vld [vmem:[#allocation4 + $0xe0] sm:$0xff] }
 0x1cc   :  { %1572 = vmatpush1.bf16.msra.mxu0 %v2259_v49  ;;  %v1629_v49 = vld [vmem:[#allocation4 + $0xe8] sm:$0xff] }
 0x1cd   :  { %1453 = vmatpush1.bf16.msra.mxu1 %v2262_v50  ;;  %1573 = vmatprep.subr.bf16.mxu0 %v2267_v52  ;;  %v1968_v50 = vpack.c.bf16 %v1629_v49, %v1628_v48  ;;  %v1612_v52 = vld [vmem:[#allocation4 + $0x60] sm:$0xff] }
 0x1ce   :  { %1454 = vmatprep.subr.bf16.mxu1 %v2270_v53  ;;  %v1613_v53 = vld [vmem:[#allocation4 + $0x68] sm:$0xff] }
 0x1d0   :  { %1574 = vmatpush1.bf16.msra.mxu0 %v2265_v54  ;;  %v1970_v54 = vpack.c.bf16 %v1613_v53, %v1612_v52 }
 0x1d1   :  { %1455 = vmatpush1.bf16.msra.mxu1 %v2268_v55  ;;  %1575 = vmatprep.subr.bf16.mxu0 %v2273_v56  ;;  %v1630_v55 = vld [vmem:[#allocation4 + $0xf0] sm:$0xff]  ;;  %v1631_v56 = vld [vmem:[#allocation4 + $0xf8] sm:$0xff] }
 0x1d2   :  { %1456 = vmatprep.subr.bf16.mxu1 %v2276_v57  ;;  %v1972_v57 = vpack.c.bf16 %v1631_v56, %v1630_v55 }
 0x1d4   :  { %1576 = vmatpush1.bf16.msra.mxu0 %v2271_v59  ;;  %v1614_v59 = vld [vmem:[#allocation4 + $0x70] sm:$0xff] }
 0x1d5   :  { %1457 = vmatpush1.bf16.msra.mxu1 %v2274_v60  ;;  %1577 = vmatprep.subr.bf16.mxu0 %v2279_v62  ;;  %v1615_v60 = vld [vmem:[#allocation4 + $0x78] sm:$0xff] }
 0x1d6   :  { %1458 = vmatprep.subr.bf16.mxu1 %v2282_v1  ;;  %v1974_v62 = vpack.c.bf16 %v1615_v60, %v1614_v59  ;;  %v379_v1 = vshrl.u32 %v48_v51, 7 }
 0x1d8   :  { %1578 = vmatpush1.bf16.msra.mxu0 %v2277_v63  ;;  %v380_v63 = vsub.s32 0, %v379_v1 }
 0x1d9   :  { %1459 = vmatpush1.bf16.msra.mxu1 %v2280_v2  ;;  %1579 = vmatprep.subr.bf16.mxu0 %v2285_v5  ;;  %v376_v2 = vld [vmem:[%s2516_s2] sm:$0x3]  ;;  %v384_v5 = vsub.s32 1, %v379_v1 }
 0x1da   :  { %1460 = vmatprep.subr.bf16.mxu1 %v2288_v7  ;;  %v381_v35 = vrot.slane %v376_v2, %v380_v63 }
 0x1dc   :  { %1580 = vmatpush1.bf16.msra.mxu0 %v2283_v6 }
 0x1dd   :  { %1461 = vmatpush1.bf16.msra.mxu1 %v2286_v8  ;;  %1581 = vmatprep.subr.bf16.mxu0 %v2291_v9  ;;  %v385_v8 = vrot.slane %v376_v2, %v384_v5 }
 0x1de   :  { %1945 = vmatprep.subr.bf16.mxu1 %v1944_v11 }
 0x1e0   :  { %1582 = vmatpush1.bf16.msra.mxu0 %v2289_v61  ;;  %1463 = vmatmul.mubr.bf16.vlgmr.msra.gmra.mrb[0].mxu1 %v176_v3 }
 0x1e1   :  { %1583 = vmatprep.subr.bf16.mxu0 %v2294_v16  ;;  %1947 = vmatpush3.bf16.msra.mxu1 %v1946_v17 }
 0x1e2   :  { %1949 = vmatprep.subr.bf16.mxu1 %v1948_v18 }
 0x1e4   :  { %1584 = vmatpush1.bf16.msra.mxu0 %v2292_v4 }
 0x1e5   :  { %1951 = vmatpush3.bf16.msra.mxu1 %v1950_v23 }
 0x1e6   :  { %1953 = vmatprep.subr.bf16.mxu1 %v1952_v24 }
 0x1e7   :  { %1586 = vmatmul.mubr.bf16.vlgmr.msra.gmra.mrb[0].mxu0 %v182_v29 }
 0x1e9   :  { %1955 = vmatpush3.bf16.msra.mxu1 %v1954_v30 }
 0x1ea   :  { %1957 = vmatprep.subr.bf16.mxu1 %v1956_v31 }
 0x1ed   :  { %1959 = vmatpush3.bf16.msra.mxu1 %v1958_v0 }
 0x1ee   :  { %1961 = vmatprep.subr.bf16.mxu1 %v1960_v44 }
 0x1f1   :  { %1963 = vmatpush3.bf16.msra.mxu1 %v1962_v39 }
 0x1f2   :  { %1965 = vmatprep.subr.bf16.mxu1 %v1964_v42 }
 0x1f5   :  { %1967 = vmatpush3.bf16.msra.mxu1 %v1966_v47 }
 0x1f6   :  { %1969 = vmatprep.subr.bf16.mxu1 %v1968_v50 }
 0x1f9   :  { %1971 = vmatpush3.bf16.msra.mxu1 %v1970_v54 }
 0x1fa   :  { %1973 = vmatprep.subr.bf16.mxu1 %v1972_v57 }
 0x1fd   :  { %1975 = vmatpush3.bf16.msra.mxu1 %v1974_v62 }
 0x2b3   :  { %v1464_v7 = vpop.f32.mrb[0].mxu1 }
 0x2b4   :  { %v1466_v58 = vpop.f32.mrb[1].mxu1  ;;  %v1976_v10 = vadd.f32 %v1464_v7, %v381_v35 }
 0x2b5   :  { %v1468_v6 = vpop.f32.mrb[2].mxu1  ;;  %v1978_v11 = vadd.f32 %v1466_v58, %v385_v8 }
 0x2b6   :  { %v1469_v9 = vpop.f32.mrb[3].mxu1 }
 0x2ba   :  { %v1587_v12 = vpop.f32.mrb[0].mxu0 }
 0x2bb   :  { %v1977_v13 = vadd.f32 %v1976_v10, %v1587_v12  ;;  %v1589_v14 = vpop.f32.mrb[1].mxu0 }
 0x2bc   :  { %v1979_v15 = vadd.f32 %v1978_v11, %v1589_v14  ;;  %v1591_v61 = vpop.f32.mrb[2].mxu0 }
 0x2bd   :  { %v1596_v51 = vmul.f32 0.01, %v1977_v13  ;;  %v1592_v16 = vpop.f32.mrb[3].mxu0  ;;  %vm1594_vm0 = vcmp.ge.f32.partialorder %v1977_v13, 0.0 }
 0x2be   :  { %v1597_v17 = vmul.f32 0.01, %v1979_v15  ;;  %vm1595_vm1 = vcmp.ge.f32.partialorder %v1979_v15, 0.0 }
 0x2bf   :  { %v1598_v18 = vsel %vm1594_vm0, %v1977_v13, %v1596_v51 }
 0x2c0   :  { %v1599_v3 = vsel %vm1595_vm1, %v1979_v15, %v1597_v17 }
 0x2c1   :  { %1703 = vmatprep.mubr.f32.mxu1 %v1599_v3 }
 0x2c2   :  { %1704 = vmatmul.mubr.f32.vlgmr.msra.gmra.mrb[4].mxu1 %v1598_v18 }
 0x395   :  { %v1941_v19 = vpop.f32.mrb[4].mxu1 }
 0x396   :  { %v1942_v21 = vpop.f32.mrb[5].mxu1 }
 0x397   :  { %v1943_v22 = vadd.f32 %v1942_v21, %v1941_v19 }
 0x399   :  { %v1706_v4 = vadd.f32 %v1943_v22, %v1908_v20 }
 0x39b   :  { %1709 = vst [vmem:[%s2519_s5] sm:$0xff] %v1706_v4 }
 0x39c   :  { %1714 = vsyncpa [#allocation3], 1 }
 0x39d   :  { %1715 = vsyncpa [#allocation5], 1 }

</bundles_post_ra>
